<compile_context>
chip_gen: v5e
topology: v5e:2x2
jax: 0.10.0
libtpu: 0.0.40
codegen_flags: <defaults>
</compile_context>

<pallas_src>
import jax
import jax.numpy as jnp
from jax.experimental import pallas as pl
from jax.experimental.pallas import tpu as pltpu

_HI = jax.lax.Precision.HIGHEST


# ----------------------------- Pallas kernel --------------------------------
def make_st_gcn_kernel(V, pad):
    """Kernel over one (channels, Nb*T*V) batch-chunk slab.

    Refs:
      xa_ref : (K*(Cin+1), L)   graph-aggregated, ones-augmented input
      xr_ref : (Cin+1, L)       raw ones-augmented input (residual path)
      m_ref  : (Kt, L)          0/1 temporal-tap validity masks
      wg_ref : (Cout, K*(Cin+1))  gcn 1x1 weight, BN1 scale folded
      wr_ref : (Cout, Cin+1)      residual 1x1 weight, BN fully folded
      wt_ref : (Kt, Cout, Cout)   temporal conv weight, BN2 scale folded
      b_ref  : (Cout, 2)          packed biases: [:,0]=BN1 shift, [:,1]=tcn bias
      o_ref  : (Cout, L)          output slab
    """

    def kernel(xa_ref, xr_ref, m_ref, wg_ref, wr_ref, wt_ref, b_ref, o_ref):
        Cout, L = o_ref.shape
        Kt = wt_ref.shape[0]
        f32 = jnp.float32

        # GCN: channel mix of the graph-aggregated input (+ folded BN1) + ReLU.
        z = jnp.dot(wg_ref[...], xa_ref[...], preferred_element_type=f32)
        z = jnp.maximum(z + b_ref[:, 0:1], 0.0)

        # Temporal (Kt x 1) conv, stride 1, 'same' zero padding, BN2 folded.
        # Zero-pad the lane axis by pad*V and take statically shifted slices;
        # taps that cross a sample / sequence boundary are zeroed by the mask.
        if pad > 0:
            zpad = jnp.zeros((Cout, pad * V), f32)
            zp = jnp.concatenate([zpad, z, zpad], axis=1)
        else:
            zp = z
        acc = jnp.broadcast_to(b_ref[:, 1:2], (Cout, L))
        for dt in range(Kt):
            if dt == pad:
                zs = z
            else:
                zs = zp[:, dt * V: dt * V + L] * m_ref[dt:dt + 1, :]
            acc = acc + jnp.dot(wt_ref[dt], zs, preferred_element_type=f32)

        # Residual 1x1 conv (BN + bias fully folded via the ones channel).
        res = jnp.dot(wr_ref[...], xr_ref[...], preferred_element_type=f32)

        o_ref[...] = jnp.maximum(acc + res, 0.0)

    return kernel


# ------------------------------- wrapper -------------------------------------
def fold_bn(bn, eps=1e-5):
    scale = bn['gamma'] / jnp.sqrt(bn['var'] + eps)
    shift = bn['beta'] - bn['mean'] * scale
    return scale.astype(jnp.float32), shift.astype(jnp.float32)


def st_gcn_forward(x, A, p, *, target_lanes=2048):
    """x: (N, C_in, T, V) float32 (PyTorch NCHW), A: (K, V, V) float32."""
    N, Cin, T, V = x.shape
    K = A.shape[0]
    Cout = p['wr'].shape[0]
    Kt = p['wt'].shape[0]
    pad = (Kt - 1) // 2
    TV = T * V
    f32 = jnp.float32

    x = x.astype(f32)
    A = A.astype(f32)

    # ---- fold eval-mode BN into weights / biases (wrapper-side, free) -------
    s1, h1 = fold_bn(p['bn1'])
    s2, h2 = fold_bn(p['bn2'])
    sr, hr = fold_bn(p['bnr'])

    # gcn 1x1 conv (+ bias via appended all-ones channel), BN1 scale folded.
    wg = p['wg'].reshape(K, Cout, Cin)
    bg = p['bg'].reshape(K, Cout, 1)
    wg_aug = jnp.concatenate([wg, bg], axis=2) * s1[None, :, None]  # (K,Cout,Cin+1)
    Wgcn = wg_aug.transpose(1, 0, 2).reshape(Cout, K * (Cin + 1))

    # residual 1x1 conv, BN + bias fully folded (bias via ones channel).
    Wres = jnp.concatenate(
        [p['wr'] * sr[:, None], (sr * p['br'][:, 0] + hr)[:, None]], axis=1)

    # temporal conv weights with BN2 scale folded; packed per-channel biases.
    wt2 = p['wt'] * s2[None, :, None]                         # (Kt, Cout, Cout)
    bias = jnp.stack([h1, s2 * p['bt'][:, 0] + h2], axis=1)   # (Cout, 2)

    # ---- graph aggregation, commuted onto the (small) augmented input -------
    # (1x1 channel mixing and vertex mixing commute; contracting A against the
    #  Cin-channel input removes the kron(I_T, A) / shift-matrix blow-up)
    x_aug = jnp.concatenate([x, jnp.ones((N, 1, T, V), f32)], axis=1)
    xa = jnp.einsum('nctv,kvw->nkctw', x_aug, A)              # (N,K,Cin+1,T,V)
    XA = xa.transpose(1, 2, 0, 3, 4).reshape(K * (Cin + 1), N * TV)
    XR = x_aug.transpose(1, 0, 2, 3).reshape(Cin + 1, N * TV)

    # temporal-tap validity (zero padding of the Kt x 1 conv), per output lane.
    t_idx = jnp.arange(T)[None, :] + jnp.arange(Kt)[:, None] - pad   # (Kt, T)
    mt = ((t_idx >= 0) & (t_idx < T)).astype(f32)
    masks = jnp.broadcast_to(mt[:, None, :, None],
                             (Kt, N, T, V)).reshape(Kt, N * TV)

    # ---- batch folded into the lane axis; Nb samples per grid step ----------
    Nb = max(1, min(N, target_lanes // TV))
    while N % Nb:
        Nb -= 1
    Lb = Nb * TV
    nblk = N // Nb
    Rg = K * (Cin + 1)

    out2 = pl.pallas_call(
        make_st_gcn_kernel(V=V, pad=pad),
        out_shape=jax.ShapeDtypeStruct((Cout, N * TV), f32),
        grid=(nblk,),
        in_specs=[
            pl.BlockSpec((Rg, Lb), lambda b: (0, b)),              # XA
            pl.BlockSpec((Cin + 1, Lb), lambda b: (0, b)),         # XR
            pl.BlockSpec((Kt, Lb), lambda b: (0, b)),              # masks
            pl.BlockSpec((Cout, Rg), lambda b: (0, 0)),            # Wgcn
            pl.BlockSpec((Cout, Cin + 1), lambda b: (0, 0)),       # Wres
            pl.BlockSpec((Kt, Cout, Cout), lambda b: (0, 0, 0)),   # wt2
            pl.BlockSpec((Cout, 2), lambda b: (0, 0)),             # bias pack
        ],
        out_specs=pl.BlockSpec((Cout, Lb), lambda b: (0, b)),
        compiler_params=pltpu.CompilerParams(
            dimension_semantics=("parallel",)),
    )(XA, XR, masks, Wgcn, Wres, wt2, bias)

    out = out2.reshape(Cout, N, T, V).transpose(1, 0, 2, 3)
    return out, A


# ------------------------- pure-JAX reference --------------------------------
def st_gcn_reference(x, A, p):
    N, Cin, T, V = x.shape
    K = A.shape[0]
    Cout = p['wr'].shape[0]
    Kt = p['wt'].shape[0]
    pad = (Kt - 1) // 2

    y = jnp.einsum('oc,nctv->notv', p['wg'], x, precision=_HI) \
        + p['bg'].reshape(1, -1, 1, 1)
    y = y.reshape(N, K, Cout, T, V)
    z = jnp.einsum('nkctv,kvw->nctw', y, A, precision=_HI)

    s1, h1 = fold_bn(p['bn1'])
    z = jnp.maximum(z * s1.reshape(1, Cout, 1, 1) + h1.reshape(1, Cout, 1, 1), 0.0)

    zp = jnp.pad(z, ((0, 0), (0, 0), (pad, pad), (0, 0)))
    out = jnp.broadcast_to(p['bt'].reshape(1, Cout, 1, 1), (N, Cout, T, V))
    for dt in range(Kt):
        out = out + jnp.einsum('oc,nctv->notv', p['wt'][dt],
                               zp[:, :, dt:dt + T, :], precision=_HI)
    s2, h2 = fold_bn(p['bn2'])
    out = out * s2.reshape(1, Cout, 1, 1) + h2.reshape(1, Cout, 1, 1)

    res = jnp.einsum('oc,nctv->notv', p['wr'], x, precision=_HI) \
          + p['br'].reshape(1, Cout, 1, 1)
    sr, hr = fold_bn(p['bnr'])
    res = res * sr.reshape(1, Cout, 1, 1) + hr.reshape(1, Cout, 1, 1)
    return jnp.maximum(out + res, 0.0)


# ------------------------------ params ----------------------------------------
def make_params(key, C_in, C_out, K, Kt):
    ks = jax.random.split(key, 18)

    def rnd(k, shape, scale=0.1):
        return scale * jax.random.normal(k, shape, jnp.float32)

    p = {
        'wg': rnd(ks[0], (K * C_out, C_in)),
        'bg': rnd(ks[1], (K * C_out, 1)),
        'wt': rnd(ks[2], (Kt, C_out, C_out)),
        'bt': rnd(ks[3], (C_out, 1)),
        'wr': rnd(ks[4], (C_out, C_in)),
        'br': rnd(ks[5], (C_out, 1)),
    }
    for i, name in enumerate(['bn1', 'bn2', 'bnr']):
        b = 6 + 4 * i
        p[name] = dict(
            gamma=1.0 + rnd(ks[b], (C_out,)),
            beta=rnd(ks[b + 1], (C_out,)),
            mean=rnd(ks[b + 2], (C_out,)),
            var=1.0 + jnp.abs(rnd(ks[b + 3], (C_out,))),
        )
    return p


if __name__ == "__main__":
    # st_gcn(in_channels=4, out_channels=8, kernel_size=(3, 3), stride=1,
    #        residual=True, attention_type='original')
    N, C_in, C_out, T, V = 2, 4, 8, 16, 16
    Kt, K = 3, 3   # kernel_size = (temporal Kt, spatial K) ; K == A.shape[0]

    key = jax.random.PRNGKey(0)
    kx, ka, kp = jax.random.split(key, 3)
    x = jax.random.normal(kx, (N, C_in, T, V), jnp.float32)
    A = jnp.abs(jax.random.normal(ka, (K, V, V), jnp.float32)) * 0.1
    params = make_params(kp, C_in, C_out, K, Kt)

    out, A_out = st_gcn_forward(x, A, params)
    out = jax.block_until_ready(out)

    ref = st_gcn_reference(x, A, params)
    assert out.shape == (N, C_out, T, V)
    err = float(jnp.max(jnp.abs(out - ref)))
    # kernel/wrapper matmuls run at default precision (bf16 MXU passes), the
    # reference at HIGHEST -> loosened tolerance.
    assert jnp.allclose(out, ref, rtol=2e-2, atol=2e-2), f"max abs err {err}"
    assert jnp.allclose(A_out, A)

    print("KERNEL_OK")
</pallas_src>

<mosaic_0001>
module attributes {stable_mosaic.version = 11 : i64} {
  func.func @kernel(%arg0: i32, %arg1: memref<15x512xf32, #tpu.memory_space<vmem>>, %arg2: memref<5x512xf32, #tpu.memory_space<vmem>>, %arg3: memref<3x512xf32, #tpu.memory_space<vmem>>, %arg4: memref<8x15xf32, #tpu.memory_space<vmem>>, %arg5: memref<8x5xf32, #tpu.memory_space<vmem>>, %arg6: memref<3x8x8xf32, #tpu.memory_space<vmem>>, %arg7: memref<8x2xf32, #tpu.memory_space<vmem>>, %arg8: memref<8x512xf32, #tpu.memory_space<vmem>>) attributes {dimension_semantics = [#tpu.dimension_semantics<parallel>], iteration_bounds = array<i64: 1>, scalar_prefetch = 0 : i64, scratch_operands = 0 : i64, tpu.core_type = #tpu.core_type<tc>, window_params = [{transform_indices = @transform_0, window_bounds = array<i64: 15, 512>}, {transform_indices = @transform_1, window_bounds = array<i64: 5, 512>}, {transform_indices = @transform_2, window_bounds = array<i64: 3, 512>}, {pipeline_mode = #tpu.pipeline_mode<synchronous>, transform_indices = @transform_3, window_bounds = array<i64: 8, 15>}, {pipeline_mode = #tpu.pipeline_mode<synchronous>, transform_indices = @transform_4, window_bounds = array<i64: 8, 5>}, {pipeline_mode = #tpu.pipeline_mode<synchronous>, transform_indices = @transform_5, window_bounds = array<i64: 3, 8, 8>}, {pipeline_mode = #tpu.pipeline_mode<synchronous>, transform_indices = @transform_6, window_bounds = array<i64: 8, 2>}, {transform_indices = @transform_7, window_bounds = array<i64: 8, 512>}]} {
    %c0 = arith.constant 0 : index
    %c0_0 = arith.constant 0 : index
    %0 = vector.load %arg4[%c0, %c0_0] : memref<8x15xf32, #tpu.memory_space<vmem>>, vector<8x15xf32>
    %c0_1 = arith.constant 0 : index
    %c0_2 = arith.constant 0 : index
    %1 = vector.load %arg1[%c0_1, %c0_2] : memref<15x512xf32, #tpu.memory_space<vmem>>, vector<15x512xf32>
    %cst = arith.constant dense<0.000000e+00> : vector<8x512xf32>
    %2 = tpu.matmul %0, %1, %cst {dimension_numbers = #tpu.dot_dimension_numbers<[1], [0], [0], [1], [0, 0, 1, 1], [], []>} : vector<8x15xf32>, vector<15x512xf32>, vector<8x512xf32> -> vector<8x512xf32>
    %c0_3 = arith.constant 0 : index
    %c0_4 = arith.constant 0 : index
    %3 = vector.load %arg7[%c0_3, %c0_4] : memref<8x2xf32, #tpu.memory_space<vmem>>, vector<8x1xf32>
    %4 = vector.broadcast %3 : vector<8x1xf32> to vector<8x512xf32>
    %5 = arith.addf %2, %4 : vector<8x512xf32>
    %cst_5 = arith.constant 0.000000e+00 : f32
    %6 = vector.broadcast %cst_5 : f32 to vector<8x512xf32>
    %7 = arith.maximumf %5, %6 : vector<8x512xf32>
    %cst_6 = arith.constant 0.000000e+00 : f32
    %8 = vector.broadcast %cst_6 : f32 to vector<8x16xf32>
    %9 = tpu.concatenate %8, %7, %8 in 1 : vector<8x16xf32>, vector<8x512xf32>, vector<8x16xf32> -> vector<8x544xf32>
    %c0_7 = arith.constant 0 : index
    %c1 = arith.constant 1 : index
    %10 = vector.load %arg7[%c0_7, %c1] : memref<8x2xf32, #tpu.memory_space<vmem>>, vector<8x1xf32>
    %11 = vector.shape_cast %10 : vector<8x1xf32> to vector<8x1xf32>
    %12 = vector.broadcast %11 : vector<8x1xf32> to vector<8x512xf32>
    %13 = vector.extract_strided_slice %9 {offsets = [0, 0], sizes = [8, 512], strides = [1, 1]} : vector<8x544xf32> to vector<8x512xf32>
    %c0_8 = arith.constant 0 : index
    %c0_9 = arith.constant 0 : index
    %14 = vector.load %arg3[%c0_8, %c0_9] : memref<3x512xf32, #tpu.memory_space<vmem>>, vector<1x512xf32>
    %15 = vector.broadcast %14 : vector<1x512xf32> to vector<8x512xf32>
    %16 = arith.mulf %13, %15 : vector<8x512xf32>
    %c0_10 = arith.constant 0 : index
    %c0_11 = arith.constant 0 : index
    %c0_12 = arith.constant 0 : index
    %17 = vector.load %arg6[%c0_10, %c0_11, %c0_12] : memref<3x8x8xf32, #tpu.memory_space<vmem>>, vector<1x8x8xf32>
    %18 = vector.shape_cast %17 : vector<1x8x8xf32> to vector<8x8xf32>
    %cst_13 = arith.constant dense<0.000000e+00> : vector<8x512xf32>
    %19 = tpu.matmul %18, %16, %cst_13 {dimension_numbers = #tpu.dot_dimension_numbers<[1], [0], [0], [1], [0, 0, 1, 1], [], []>} : vector<8x8xf32>, vector<8x512xf32>, vector<8x512xf32> -> vector<8x512xf32>
    %20 = arith.addf %12, %19 : vector<8x512xf32>
    %c1_14 = arith.constant 1 : index
    %c0_15 = arith.constant 0 : index
    %c0_16 = arith.constant 0 : index
    %21 = vector.load %arg6[%c1_14, %c0_15, %c0_16] : memref<3x8x8xf32, #tpu.memory_space<vmem>>, vector<1x8x8xf32>
    %22 = vector.shape_cast %21 : vector<1x8x8xf32> to vector<8x8xf32>
    %cst_17 = arith.constant dense<0.000000e+00> : vector<8x512xf32>
    %23 = tpu.matmul %22, %7, %cst_17 {dimension_numbers = #tpu.dot_dimension_numbers<[1], [0], [0], [1], [0, 0, 1, 1], [], []>} : vector<8x8xf32>, vector<8x512xf32>, vector<8x512xf32> -> vector<8x512xf32>
    %24 = arith.addf %20, %23 : vector<8x512xf32>
    %25 = vector.extract_strided_slice %9 {offsets = [0, 32], sizes = [8, 512], strides = [1, 1]} : vector<8x544xf32> to vector<8x512xf32>
    %c2 = arith.constant 2 : index
    %c0_18 = arith.constant 0 : index
    %26 = vector.load %arg3[%c2, %c0_18] : memref<3x512xf32, #tpu.memory_space<vmem>>, vector<1x512xf32>
    %27 = vector.broadcast %26 : vector<1x512xf32> to vector<8x512xf32>
    %28 = arith.mulf %25, %27 : vector<8x512xf32>
    %c2_19 = arith.constant 2 : index
    %c0_20 = arith.constant 0 : index
    %c0_21 = arith.constant 0 : index
    %29 = vector.load %arg6[%c2_19, %c0_20, %c0_21] : memref<3x8x8xf32, #tpu.memory_space<vmem>>, vector<1x8x8xf32>
    %30 = vector.shape_cast %29 : vector<1x8x8xf32> to vector<8x8xf32>
    %cst_22 = arith.constant dense<0.000000e+00> : vector<8x512xf32>
    %31 = tpu.matmul %30, %28, %cst_22 {dimension_numbers = #tpu.dot_dimension_numbers<[1], [0], [0], [1], [0, 0, 1, 1], [], []>} : vector<8x8xf32>, vector<8x512xf32>, vector<8x512xf32> -> vector<8x512xf32>
    %32 = arith.addf %24, %31 : vector<8x512xf32>
    %c0_23 = arith.constant 0 : index
    %c0_24 = arith.constant 0 : index
    %33 = vector.load %arg5[%c0_23, %c0_24] : memref<8x5xf32, #tpu.memory_space<vmem>>, vector<8x5xf32>
    %c0_25 = arith.constant 0 : index
    %c0_26 = arith.constant 0 : index
    %34 = vector.load %arg2[%c0_25, %c0_26] : memref<5x512xf32, #tpu.memory_space<vmem>>, vector<5x512xf32>
    %cst_27 = arith.constant dense<0.000000e+00> : vector<8x512xf32>
    %35 = tpu.matmul %33, %34, %cst_27 {dimension_numbers = #tpu.dot_dimension_numbers<[1], [0], [0], [1], [0, 0, 1, 1], [], []>} : vector<8x5xf32>, vector<5x512xf32>, vector<8x512xf32> -> vector<8x512xf32>
    %36 = arith.addf %32, %35 : vector<8x512xf32>
    %cst_28 = arith.constant 0.000000e+00 : f32
    %37 = vector.broadcast %cst_28 : f32 to vector<8x512xf32>
    %38 = arith.maximumf %36, %37 : vector<8x512xf32>
    %c0_29 = arith.constant 0 : index
    %c0_30 = arith.constant 0 : index
    %39 = vector.load %arg8[%c0_29, %c0_30] : memref<8x512xf32, #tpu.memory_space<vmem>>, vector<8x512xf32>
    tpu.vector_store %arg8[%c0_29, %c0_30], %38 {strides = array<i32>} : memref<8x512xf32, #tpu.memory_space<vmem>>, vector<8x512xf32>,
    return
  }
  func.func @transform_0(%arg0: i32) -> (i32, i32) {
    %c0_i32 = arith.constant 0 : i32
    %c0_i32_0 = arith.constant 0 : i32
    return %c0_i32, %arg0 : i32, i32
  }
  func.func @transform_1(%arg0: i32) -> (i32, i32) {
    %c0_i32 = arith.constant 0 : i32
    %c0_i32_0 = arith.constant 0 : i32
    return %c0_i32, %arg0 : i32, i32
  }
  func.func @transform_2(%arg0: i32) -> (i32, i32) {
    %c0_i32 = arith.constant 0 : i32
    %c0_i32_0 = arith.constant 0 : i32
    return %c0_i32, %arg0 : i32, i32
  }
  func.func @transform_3(%arg0: i32) -> (i32, i32) {
    %c0_i32 = arith.constant 0 : i32
    %c0_i32_0 = arith.constant 0 : i32
    %c0_i32_1 = arith.constant 0 : i32
    return %c0_i32, %c0_i32_0 : i32, i32
  }
  func.func @transform_4(%arg0: i32) -> (i32, i32) {
    %c0_i32 = arith.constant 0 : i32
    %c0_i32_0 = arith.constant 0 : i32
    %c0_i32_1 = arith.constant 0 : i32
    return %c0_i32, %c0_i32_0 : i32, i32
  }
  func.func @transform_5(%arg0: i32) -> (i32, i32, i32) {
    %c0_i32 = arith.constant 0 : i32
    %c0_i32_0 = arith.constant 0 : i32
    %c0_i32_1 = arith.constant 0 : i32
    %c0_i32_2 = arith.constant 0 : i32
    return %c0_i32, %c0_i32_0, %c0_i32_1 : i32, i32, i32
  }
  func.func @transform_6(%arg0: i32) -> (i32, i32) {
    %c0_i32 = arith.constant 0 : i32
    %c0_i32_0 = arith.constant 0 : i32
    %c0_i32_1 = arith.constant 0 : i32
    return %c0_i32, %c0_i32_0 : i32, i32
  }
  func.func @transform_7(%arg0: i32) -> (i32, i32) {
    %c0_i32 = arith.constant 0 : i32
    %c0_i32_0 = arith.constant 0 : i32
    return %c0_i32, %arg0 : i32, i32
  }
}

</mosaic_0001>

<bundles_post_ra>
// kernel: tpu_custom_call.1
= control target key start
LH: loop header
LB: loop body
LE: loop exit
PB: predicated region body
PF: predicated region fallthrough
CT: control target
= control target key end

     0   :  { %12 = vsyncpa [#allocation3], 0  ;;  %s1049_s0 = inlined_call_operand.hbm [shape: f32[15,512], index: 0, kind: input, shape index: {}]   ;;  %s1050_s1 = inlined_call_operand.hbm [shape: f32[5,512], index: 1, kind: input, shape index: {}]   ;;  %s1051_s2 = inlined_call_operand.hbm [shape: f32[3,512], index: 2, kind: input, shape index: {}]   ;;  %s1052_s3 = inlined_call_operand.vmem [shape: f32[8,15], index: 3, kind: input, shape index: {}]   ;;  %s1053_s4 = inlined_call_operand.hbm [shape: f32[8,5], index: 4, kind: input, shape index: {}]   ;;  %s1054_s5 = inlined_call_operand.hbm [shape: f32[3,8,8], index: 5, kind: input, shape index: {}]   ;;  %s1055_s6 = inlined_call_operand.vmem [shape: f32[8,2], index: 6, kind: input, shape index: {}]   ;;  %s1056_s7 = inlined_call_operand.hbm [shape: f32[8,512], index: 7, kind: output, shape index: {}]  }
   0x1   :  { %13 = vsyncpa [#allocation6], 0 }
   0x2   :  { %14 = vsyncpa [#allocation9], 0  ;;  %s34_s26 = sshll.u32 %s1050_s1, 4  ;;  %s35_s26 = int_to_ptr.hbm [resolvable:$true] %s34_s26 }
   0x3   :  { %15 = vsyncpa [#allocation4], 0  ;;  %s915_s27 = smov [#allocation5]   ;;  %s58_s8 = sshll.u32 %s1053_s4, 4  ;;  %s59_s8 = int_to_ptr.hbm [resolvable:$true] %s58_s8 }
   0x4   :  { %s36_s28 = sshll.u32 %s915_s27, 4  ;;  %s916_s9 = smov [#allocation8]   ;;  %s37_s28 = int_to_ptr.vmem [resolvable:$true] %s36_s28 }
   0x5   :  { %39 = dma.hbm_to_vmem [thread:$0]  %s35_s26, 512, %s37_s28, [#allocation6]  }
   0x6   :  { %s60_s10 = sshll.u32 %s916_s9, 4  ;;  %s20_s13 = sshll.u32 %s1049_s0, 4  ;;  %s61_s10 = int_to_ptr.vmem [resolvable:$true] %s60_s10  ;;  %s21_s13 = int_to_ptr.hbm [resolvable:$true] %s20_s13 }
   0x7   :  { %63 = dma.hbm_to_vmem [thread:$0]  %s59_s8, 128, %s61_s10, [#allocation9]  }
   0x8   :  { %s917_s1 = smov [#allocation2]   ;;  %s45_s17 = sshll.u32 %s1051_s2, 4  ;;  %s46_s17 = int_to_ptr.hbm [resolvable:$true] %s45_s17 }
   0x9   :  { %s22_s14 = sshll.u32 %s917_s1, 4  ;;  %s918_s18 = smov 512   ;;  %s23_s14 = int_to_ptr.vmem [resolvable:$true] %s22_s14 }
   0xa   :  { %s919_s4 = smov 32   ;;  %s920_s19 = smov [#allocation7]  }
   0xb   :  { %28 = dma.hbm_to_vmem [thread:$0]  %s21_s13, 1024, %s23_s14, [#allocation3], %s918_s18, %s918_s18, %s919_s4  }
   0xc   :  { %s47_s20 = sshll.u32 %s920_s19, 4  ;;  %s68_s0 = sshll.u32 %s1054_s5, 4  ;;  %s48_s20 = int_to_ptr.vmem [resolvable:$true] %s47_s20  ;;  %s69_s0 = int_to_ptr.hbm [resolvable:$true] %s68_s0 }
   0xd   :  { %50 = dma.hbm_to_vmem [thread:$0]  %s46_s17, 256, %s48_s20, [#allocation6]  }
   0xe   :  { %s921_s23 = smov [#allocation10]   ;;  %s922_s25 = smov 128  }
   0xf   :  { %s70_s24 = sshll.u32 %s921_s23, 4  ;;  %s923_s26 = smov 8   ;;  %s71_s24 = int_to_ptr.vmem [resolvable:$true] %s70_s24 }
  0x10   :  { %76 = dma.hbm_to_vmem [thread:$0]  %s69_s0, 384, %s71_s24, [#allocation9], %s922_s25, %s922_s25, %s923_s26  }
  0x11   :  { %907 = dma.done.wait [#allocation3], 1024  }
  0x12   :  { %908 = vsyncadd [#allocation3], 4294966272 }
  0x13   :  { %909 = dma.done.wait [#allocation6], 768  }
  0x14   :  { %910 = vsyncadd [#allocation6], 4294966528 }
  0x15   :  { %911 = dma.done.wait [#allocation9], 512  }
  0x16   :  { %912 = vsyncadd [#allocation9], 4294966784  ;;  %v924_v0 = vmov 0   ;;  %vm118_vm0 = vcmask 1046528   ;;  %v106_v1 = vld [vmem:[#allocation2 + $0x30] sm:$0x7f] }
  0x17   :  { %751 = vset.pattern.permute.xlu0 %v924_v0  ;;  %v107_v2 = vld [vmem:[#allocation2 + $0x38] sm:$0x7f]  ;;  %v102_v3 = vld [vmem:[#allocation2 + $0x10] sm:$0xff]  ;;  %713 = vmatpush.msk.msra.mxu2 %vm118_vm0, %v106_v1  ;;  %v99_v5 = vld [vmem:[%s1052_s3] sm:$0xff]  ;;  %vm114_vm1 = vcmask 121856   ;;  %s925_s3 = smov 16  }
  0x18   :  { %715 = vmatpush.msk.msra.mxu3 %vm118_vm0, %v107_v2  ;;  %v103_v4 = vld [vmem:[#allocation2 + $0x18] sm:$0xff]  ;;  %v104_v6 = vld [vmem:[#allocation2 + $0x20] sm:$0x7f]  ;;  %v105_v7 = vld [vmem:[#allocation2 + $0x28] sm:$0x7f]  ;;  %vm227_vm2 = vcmask 130048  }
  0x19   :  { %709 = vmatpush.msk.msra.mxu0 %vm118_vm0, %v104_v6  ;;  %v100_v8 = vld [vmem:[#allocation2] sm:$0xff]  ;;  %186 = vmatpush.msra.mxu2 %v102_v3  ;;  %v101_v10 = vld [vmem:[#allocation2 + $0x8] sm:$0xff]  ;;  %vm449_vm3 = vcmask 261120   ;;  %v256_v37 = vld [vmem:[#allocation10] sm:$0xff]  ;;  %vm257_vm4 = vcmask 64512   ;;  %v927_v63 = vmov 1  }
  0x1a   :  { %206 = vmatpush.msra.mxu3 %v103_v4  ;;  %v994_v9 = vld [vmem:[%s1055_s6] sm:$0xff]  ;;  %714 = vmatmul.msk.f32.vlgmr.msra.gmra.mxu2 %vm114_vm1, %v99_v5  ;;  %s926_s6 = smov 96   ;;  %vm480_vm5 = vcmask 785408   ;;  %v464_v3 = vld [vmem:[#allocation10 + $0x10] sm:$0xff]  ;;  %vm585_vm6 = vcmask 1044480   ;;  %v576_v6 = vld [vmem:[#allocation8] sm:$0xff] }
  0x1b   :  { %716 = vmatmul.msk.f32.vlgmr.msra.gmra.mxu3 %vm114_vm1, %v99_v5  ;;  %711 = vmatpush.msk.msra.mxu1 %vm118_vm0, %v105_v7  ;;  %v435_v11 = vld [vmem:[#allocation7 + $0x2] ss:$4 sm:$0xf]  ;;  %v242_v30 = vld [vmem:[#allocation7] ss:$4 sm:$0xf] }
  0x1c   :  { %146 = vmatpush.msra.mxu0 %v100_v8  ;;  %111 = vperm.xlu0 %751, %v994_v9   ;;  %v438_v12 = vperm.slane %v435_v11, 1  ;;  %v439_v13 = vperm.slane %v435_v11, 2  ;;  %v437_v14 = vperm.slane %v435_v11, 0  ;;  %v440_v24 = vperm.slane %v435_v11, 3  ;;  %v346_v62 = vld [vmem:[#allocation10 + $0x8] sm:$0xff]  ;;  %s928_s29 = smov [#allocation11]  }
  0x1d   :  { %710 = vmatmul.msk.f32.vlgmr.msra.gmra.mxu0 %vm114_vm1, %v99_v5  ;;  %166 = vmatpush.msra.mxu1 %v101_v10  ;;  %v246_v32 = vperm.slane %v242_v30, 2  ;;  %v247_v39 = vperm.slane %v242_v30, 3  ;;  %v244_v51 = vperm.slane %v242_v30, 0  ;;  %v245_v52 = vperm.slane %v242_v30, 1  ;;  %s695_s30 = sshll.u32 %s928_s29, 4  ;;  %s697_s10 = sshll.u32 %s1056_s7, 4  ;;  %s696_s30 = int_to_ptr.vmem [resolvable:$true] %s695_s30  ;;  %s698_s10 = int_to_ptr.hbm [resolvable:$true] %s697_s10 }
  0x1e   :  { %712 = vmatmul.msk.f32.vlgmr.msra.gmra.mxu1 %vm114_vm1, %v99_v5  ;;  %443 = vrot.lane.b32.xlu2 %v438_v12, %s919_s4  ;;  %v577_v5 = vld [vmem:[#allocation5] sm:$0x1f]  ;;  %vm581_vm7 = vcmask 39936  }
  0x24   :  { %762 = vset.pattern.permute.xlu0 %v927_v63 }
  0x26   :  { %445 = vrot.lane.b32.xlu2 %v439_v13, %s919_s4 }
  0x2e   :  { %441 = vrot.lane.b32.xlu2 %v437_v14, %s919_s4  ;;  %v578_v14 = vld [vmem:[#allocation5 + $0x8] sm:$0x1f] }
  0x78   :  { %v444_v29 = vpop.permute.xlu2 %443 }
  0x80   :  { %v446_v36 = vpop.permute.xlu2 %445 }
  0x81   :  { %v451_v40 = vsel %vm449_vm3, %v444_v29, %v446_v36 }
  0x88   :  { %v442_v50 = vpop.permute.xlu2 %441 }
  0x89   :  { %v450_v54 = vsel %vm449_vm3, %v442_v50, %v444_v29 }
  0x8e   :  { %v112_v15 = vpop.permute.xlu0 %111 }
  0x9a   :  { %v148_v26 = vpop.f32.mrf.mxu0 }
  0x9b   :  { %v168_v16 = vpop.f32.mrf.mxu1  ;;  %v149_v27 = vadd.f32 %v148_v26, %v112_v15 }
  0x9c   :  { %v1005_v17 = vadd.f32 %v168_v16, %v112_v15  ;;  %v580_v16 = vld [vmem:[#allocation5 + $0x18] sm:$0x1f] }
  0x9d   :  { %v188_v18 = vpop.f32.mrf.mxu2  ;;  %v211_v28 = vmax.f32 %v149_v27, 0.0 }
  0x9e   :  { %v212_v19 = vmax.f32 %v1005_v17, 0.0  ;;  %v189_v20 = vadd.f32 %v188_v18, %v112_v15  ;;  %v208_v22 = vpop.f32.mrf.mxu3 }
  0x9f   :  { %v209_v23 = vadd.f32 %v208_v22, %v112_v15  ;;  %v579_v15 = vld [vmem:[#allocation5 + $0x10] sm:$0x1f] }
  0xa0   :  { %v213_v21 = vmax.f32 %v189_v20, 0.0  ;;  %221 = vrot.lane.b32.xlu0 %v212_v19, %s925_s3 }
  0xa1   :  { %v214_v25 = vmax.f32 %v209_v23, 0.0 }
  0xa2   :  { %223 = vrot.lane.b32.xlu1 %v213_v21, %s925_s3 }
  0xa8   :  { %447 = vrot.lane.b32.xlu0 %v440_v24, %s919_s4 }
  0xaa   :  { %225 = vrot.lane.b32.xlu1 %v214_v25, %s925_s3 }
  0xb2   :  { %219 = vrot.lane.b32.xlu1 %v211_v28, %s925_s3 }
 0x112   :  { %v222_v31 = vpop.permute.xlu0 %221 }
 0x114   :  { %v224_v33 = vpop.permute.xlu1 %223 }
 0x115   :  { %v229_v34 = vsel %vm227_vm2, %v222_v31, %v224_v33 }
 0x116   :  { %v254_v35 = vmul.f32 %v246_v32, %v229_v34  ;;  %v460_v45 = vmul.f32 %v451_v40, %v229_v34 }
 0x118   :  { %316 = vmatpush.msrb.mxu2 %v254_v35 }
 0x119   :  { %719 = vmatmul.msk.f32.vlgmr.msrb.gmra.mxu2 %vm257_vm4, %v256_v37 }
 0x11a   :  { %405 = vmatpush.msra.mxu2 %v213_v21  ;;  %v448_v38 = vpop.permute.xlu0 %447 }
 0x11b   :  { %v452_v41 = vsel %vm449_vm3, %v446_v36, %v448_v38 }
 0x11c   :  { %v226_v42 = vpop.permute.xlu1 %225 }
 0x11d   :  { %v230_v43 = vsel %vm227_vm2, %v224_v33, %v226_v42  ;;  %v237_v44 = vsel %vm227_vm2, %v226_v42, 0.0 }
 0x11e   :  { %v461_v46 = vmul.f32 %v452_v41, %v230_v43  ;;  %v462_v47 = vmul.f32 %v448_v38, %v237_v44  ;;  %v255_v48 = vmul.f32 %v247_v39, %v230_v43 }
 0x120   :  { %336 = vmatpush.msrb.mxu3 %v255_v48  ;;  %478 = vrot.lane.b32.xlu1 %v462_v47, %s926_s6  ;;  %v752_v49 = vpack.i.bf16 %v461_v46, %v460_v45 }
 0x121   :  { %720 = vmatmul.msk.f32.vlgmr.msrb.gmra.mxu3 %vm257_vm4, %v256_v37  ;;  %723 = vmatmul.msk.f32.vlgmr.msra.gmra.mxu2 %vm257_vm4, %v346_v62 }
 0x122   :  { %425 = vmatpush.msra.mxu3 %v214_v25  ;;  %753 = vrot.lane.b32.xlu0 %v752_v49, %s926_s6 }
 0x124   :  { %v220_v53 = vpop.permute.xlu1 %219 }
 0x125   :  { %v228_v55 = vsel %vm227_vm2, %v220_v53, %v222_v31  ;;  %v236_v56 = vsel %vm227_vm2, 0.0, %v220_v53 }
 0x126   :  { %v458_v57 = vmul.f32 %v442_v50, %v236_v56  ;;  %v459_v58 = vmul.f32 %v450_v54, %v228_v55  ;;  %v252_v59 = vmul.f32 %v244_v51, %v236_v56  ;;  %v253_v60 = vmul.f32 %v245_v52, %v228_v55 }
 0x128   :  { %276 = vmatpush.msrb.mxu0 %v252_v59  ;;  %296 = vmatpush.msrb.mxu1 %v253_v60  ;;  %v757_v61 = vpack.i.bf16 %v459_v58, %v458_v57 }
 0x129   :  { %717 = vmatmul.msk.f32.vlgmr.msrb.gmra.mxu0 %vm257_vm4, %v256_v37  ;;  %718 = vmatmul.msk.f32.vlgmr.msrb.gmra.mxu1 %vm257_vm4, %v256_v37 }
 0x12a   :  { %365 = vmatpush.msra.mxu0 %v211_v28  ;;  %385 = vmatpush.msra.mxu1 %v212_v19 }
 0x12b   :  { %758 = vrot.lane.b32.xlu2 %v757_v61, %s926_s6  ;;  %724 = vmatmul.msk.f32.vlgmr.msra.gmra.mxu3 %vm257_vm4, %v346_v62 }
 0x12c   :  { %239 = vperm.xlu0 %762, %v994_v9  }
 0x131   :  { %721 = vmatmul.msk.f32.vlgmr.msra.gmra.mxu0 %vm257_vm4, %v346_v62  ;;  %722 = vmatmul.msk.f32.vlgmr.msra.gmra.mxu1 %vm257_vm4, %v346_v62 }
 0x185   :  { %v759_v0 = vpop.permute.xlu2 %758 }
 0x186   :  { %v761_v1 = vunpack.i.h.bf16 %v759_v0  ;;  %v760_v2 = vunpack.i.l.bf16 %v759_v0 }
 0x188   :  { %v481_v4 = vsel %vm480_vm5, %v760_v2, %v761_v1 }
 0x189   :  { %507 = vmatpush.msrb.mxu0 %v481_v4 }
 0x18a   :  { %725 = vmatmul.msk.f32.vlgmr.msrb.gmra.mxu0 %vm257_vm4, %v464_v3 }
 0x18b   :  { %729 = vmatpush.msk.msra.mxu0 %vm585_vm6, %v577_v5 }
 0x192   :  { %730 = vmatmul.msk.f32.vlgmr.msra.gmra.mxu0 %vm581_vm7, %v576_v6  ;;  %v479_v10 = vpop.permute.xlu1 %478 }
 0x194   :  { %v754_v7 = vpop.permute.xlu0 %753 }
 0x195   :  { %v756_v8 = vunpack.i.h.bf16 %v754_v7  ;;  %v755_v9 = vunpack.i.l.bf16 %v754_v7 }
 0x197   :  { %v482_v11 = vsel %vm480_vm5, %v761_v1, %v755_v9  ;;  %v483_v12 = vsel %vm480_vm5, %v755_v9, %v756_v8  ;;  %v484_v13 = vsel %vm480_vm5, %v756_v8, %v479_v10 }
 0x198   :  { %527 = vmatpush.msrb.mxu1 %v482_v11  ;;  %547 = vmatpush.msrb.mxu2 %v483_v12 }
 0x199   :  { %567 = vmatpush.msrb.mxu3 %v484_v13  ;;  %726 = vmatmul.msk.f32.vlgmr.msrb.gmra.mxu1 %vm257_vm4, %v464_v3 }
 0x19a   :  { %727 = vmatmul.msk.f32.vlgmr.msrb.gmra.mxu2 %vm257_vm4, %v464_v3  ;;  %728 = vmatmul.msk.f32.vlgmr.msrb.gmra.mxu3 %vm257_vm4, %v464_v3 }
 0x19b   :  { %731 = vmatpush.msk.msra.mxu1 %vm585_vm6, %v578_v14  ;;  %733 = vmatpush.msk.msra.mxu2 %vm585_vm6, %v579_v15 }
 0x19c   :  { %735 = vmatpush.msk.msra.mxu3 %vm585_vm6, %v580_v16  ;;  %v318_v24 = vpop.f32.mrf.mxu2 }
 0x19e   :  { %v240_v19 = vpop.permute.xlu0 %239 }
 0x19f   :  { %v343_v39 = vadd.f32 %v318_v24, %v240_v19 }
 0x1a1   :  { %732 = vmatmul.msk.f32.vlgmr.msra.gmra.mxu1 %vm581_vm7, %v576_v6 }
 0x1a2   :  { %734 = vmatmul.msk.f32.vlgmr.msra.gmra.mxu2 %vm581_vm7, %v576_v6  ;;  %736 = vmatmul.msk.f32.vlgmr.msra.gmra.mxu3 %vm581_vm7, %v576_v6 }
 0x1a4   :  { %v338_v25 = vpop.f32.mrf.mxu3  ;;  %v407_v31 = vpop.f32.mrf.mxu2 }
 0x1a5   :  { %v344_v40 = vadd.f32 %v338_v25, %v240_v19  ;;  %v432_v44 = vadd.f32 %v407_v31, %v343_v39 }
 0x1a6   :  { %v278_v17 = vpop.f32.mrf.mxu0  ;;  %v298_v20 = vpop.f32.mrf.mxu1 }
 0x1a7   :  { %v341_v21 = vadd.f32 %v278_v17, %v240_v19  ;;  %v342_v34 = vadd.f32 %v298_v20, %v240_v19 }
 0x1ae   :  { %v367_v18 = vpop.f32.mrf.mxu0  ;;  %v387_v27 = vpop.f32.mrf.mxu1 }
 0x1af   :  { %v430_v23 = vadd.f32 %v367_v18, %v341_v21  ;;  %v427_v32 = vpop.f32.mrf.mxu3  ;;  %v431_v35 = vadd.f32 %v387_v27, %v342_v34 }
 0x1b0   :  { %v433_v45 = vadd.f32 %v427_v32, %v344_v40 }
 0x207   :  { %v509_v22 = vpop.f32.mrf.mxu0 }
 0x208   :  { %v572_v26 = vadd.f32 %v509_v22, %v430_v23 }
 0x20f   :  { %v615_v28 = vpop.f32.mrf.mxu0 }
 0x210   :  { %v678_v29 = vadd.f32 %v615_v28, %v572_v26 }
 0x212   :  { %v682_v30 = vmax.f32 %v678_v29, 0.0 }
 0x214   :  { %686 = vst [vmem:[#allocation11] sm:$0xff] %v682_v30 }
 0x216   :  { %v529_v33 = vpop.f32.mrf.mxu1 }
 0x217   :  { %v573_v36 = vadd.f32 %v529_v33, %v431_v35 }
 0x21d   :  { %v549_v37 = vpop.f32.mrf.mxu2  ;;  %v569_v38 = vpop.f32.mrf.mxu3 }
 0x21e   :  { %v635_v41 = vpop.f32.mrf.mxu1  ;;  %v574_v46 = vadd.f32 %v549_v37, %v432_v44  ;;  %v575_v47 = vadd.f32 %v569_v38, %v433_v45 }
 0x21f   :  { %v679_v42 = vadd.f32 %v635_v41, %v573_v36 }
 0x221   :  { %v683_v43 = vmax.f32 %v679_v42, 0.0 }
 0x223   :  { %687 = vst [vmem:[#allocation11 + $0x8] sm:$0xff] %v683_v43 }
 0x225   :  { %v655_v48 = vpop.f32.mrf.mxu2  ;;  %v675_v49 = vpop.f32.mrf.mxu3 }
 0x226   :  { %v680_v50 = vadd.f32 %v655_v48, %v574_v46  ;;  %v681_v51 = vadd.f32 %v675_v49, %v575_v47 }
 0x228   :  { %v684_v52 = vmax.f32 %v680_v50, 0.0  ;;  %v685_v53 = vmax.f32 %v681_v51, 0.0 }
 0x22a   :  { %688 = vst [vmem:[#allocation11 + $0x10] sm:$0xff] %v684_v52 }
 0x22b   :  { %689 = vst [vmem:[#allocation11 + $0x18] sm:$0xff] %v685_v53 }
 0x22c   :  { %700 = dma.vmem_to_hbm [thread:$0]  %s696_s30, 512, %s698_s10, [#allocation4]  }
 0x22d   :  { %913 = dma.done.wait [#allocation4], 512  }
 0x22e   :  { %914 = vsyncadd [#allocation4], 4294966784 }
 0x22f   :  { %705 = vsyncpa [#allocation3], 1 }
 0x230   :  { %706 = vsyncpa [#allocation6], 1 }
 0x231   :  { %707 = vsyncpa [#allocation9], 1 }
 0x232   :  { %708 = vsyncpa [#allocation4], 1 }

</bundles_post_ra>
